<compile_context>
chip_gen: v6e
topology: v6e:2x2x1
jax: 0.10.0
libtpu: 0.0.40
codegen_flags: <defaults>
</compile_context>

<pallas_src>
import functools

import numpy as np
import jax
import jax.numpy as jnp
from jax import lax
from jax.experimental import pallas as pl
from jax.experimental.pallas import tpu as pltpu

try:  # compiled Hungarian solver if available (host-side, not a TPU op)
    from scipy.optimize import linear_sum_assignment as _scipy_lsa
except Exception:  # pragma: no cover
    _scipy_lsa = None


def _round_up(x: int, m: int) -> int:
    return ((x + m - 1) // m) * m


def _cdiv(a: int, b: int) -> int:
    return (a + b - 1) // b


# ---------------------------------------------------------------------------
# Pallas kernel: masked softmax + one fused (gather-as-matmul) cost tile
# ---------------------------------------------------------------------------
def _cost_kernel(num_types, x_ref, oh_ref, c_ref):
    # x tile = [logits | left | right]  -> [TILE_N, E + 2S]
    x = x_ref[...].astype(jnp.float32)
    col = lax.broadcasted_iota(jnp.int32, x.shape, 1)
    is_logit = col < num_types

    # numerically stable softmax restricted to the first E lanes
    xm = jnp.where(is_logit, x, -jnp.inf)
    m = jnp.max(xm, axis=-1, keepdims=True)
    e = jnp.exp(xm - m)                                    # 0 on boundary lanes
    inv = pl.reciprocal(jnp.sum(e, axis=-1, keepdims=True), approx=True)
    y = jnp.where(is_logit, e * inv, x)                    # [prob | left | right]

    # Single MXU matmul; sign & cost weights already folded into the one-hots.
    # Result stored directly to the lane-dense output tile (no extra copies).
    c_ref[...] = jnp.dot(
        y, oh_ref[...], preferred_element_type=jnp.float32).astype(c_ref.dtype)


def pallas_cost_matrix(pred_logits, pred_left, pred_right,
                       tgt_ids, tgt_spans,
                       cost_class: float = 1.0, cost_span: float = 1.0):
    """Computes the matching cost matrix C of shape [bs, num_queries, T]."""
    bs, nq, E = pred_logits.shape
    S = pred_left.shape[-1]
    T = int(tgt_ids.shape[0])
    N = bs * nq
    K = E + 2 * S                                           # fused contraction

    # ---- T tiling: lane-dense output, VMEM bounded independently of T ----
    T_pad0 = _round_up(max(T, 1), 128)
    n_t = _cdiv(T_pad0, 512)
    TILE_T = _round_up(_cdiv(T_pad0, n_t), 128)
    T_pad = n_t * TILE_T

    # ---- generation-aware VMEM budget, (8,128)-layout-padded tiles ----
    try:
        vmem_cap = int(pltpu.get_tpu_info().vmem_capacity_bytes)
    except Exception:
        vmem_cap = 64 * 2**20                               # v7x per-TC floor
    budget = int(0.45 * vmem_cap)
    K_lane = _round_up(K, 128)                              # lane padding of x tile
    K_sub = _round_up(K, 8)                                 # sublane padding of one-hot
    oh_bytes = 2 * K_sub * TILE_T * 4                       # double-buffered one-hot
    row_bytes = 2 * 4 * (K_lane + TILE_T)                   # x + out tiles per row (x2 buf)
    max_tile_n = (budget - oh_bytes) // row_bytes
    max_tile_n = max(8, min(1024, (max_tile_n // 8) * 8))

    # ---- N tiling: minimal padding, even tile count for v7x dual-TC ----
    n_n = _cdiv(N, max_tile_n)
    if N >= 16 and n_n % 2 == 1:
        n_n += 1
    TILE_N = _round_up(_cdiv(N, n_n), 8)
    N_pad = n_n * TILE_N

    # Fused row stream [logits | left | right]; keep model dtype (cast in-kernel).
    x2d = jnp.concatenate(
        [pred_logits.reshape(N, E),
         pred_left.reshape(N, S),
         pred_right.reshape(N, S)], axis=-1)                # [N, K]
    if N_pad != N:
        x2d = jnp.pad(x2d, ((0, N_pad - N), (0, 0)))

    # Stacked one-hot selection matrix with the weights and the negative sign
    # folded in (exact: scaling a one-hot is exact in f32).
    oh = jnp.concatenate(
        [(-float(cost_class)) * jax.nn.one_hot(tgt_ids, E, dtype=jnp.float32).T,
         (-float(cost_span)) * jax.nn.one_hot(tgt_spans[:, 0], S, dtype=jnp.float32).T,
         (-float(cost_span)) * jax.nn.one_hot(tgt_spans[:, 1], S, dtype=jnp.float32).T],
        axis=0)                                             # [K, T]
    if T_pad != T:
        # zero columns -> zero cost; sliced off below before the assignment.
        oh = jnp.pad(oh, ((0, 0), (0, T_pad - T)))

    est = oh_bytes + TILE_N * row_bytes
    vmem_limit = int(min(max(int(0.6 * vmem_cap), 32 * 2**20),
                         max(est + 8 * 2**20, 32 * 2**20)))

    # Advisory cost estimate for XLA scheduling around the custom call.
    flops = 2 * N_pad * T_pad * K + 8 * N_pad * K
    cost = pl.CostEstimate(
        flops=int(flops), transcendentals=int(N_pad * K),
        bytes_accessed=int(4 * (N_pad * K + K * T_pad + N_pad * T_pad)))

    kernel = functools.partial(_cost_kernel, E)

    C = pl.pallas_call(
        kernel,
        out_shape=jax.ShapeDtypeStruct((N_pad, T_pad), jnp.float32),
        grid=(n_n, n_t),
        in_specs=[
            pl.BlockSpec((TILE_N, K), lambda i, j: (i, 0)),   # row tile
            pl.BlockSpec((K, TILE_T), lambda i, j: (0, j)),   # one-hot column tile
        ],
        out_specs=pl.BlockSpec((TILE_N, TILE_T), lambda i, j: (i, j)),
        compiler_params=pltpu.CompilerParams(
            dimension_semantics=("parallel", "parallel"),
            vmem_limit_bytes=vmem_limit),
        cost_estimate=cost,
    )(x2d, oh)

    return C[:N, :T].reshape(bs, nq, T)


# ---------------------------------------------------------------------------
# Host-side rectangular Hungarian (Jonker-Volgenant style, e-maxx variant);
# scipy's compiled solver is used instead when available.
# TODO(synk): linear_sum_assignment is combinatorial CPU code with no clean
#             Pallas equivalent; solved host-side.
# ---------------------------------------------------------------------------
def linear_sum_assignment_np(cost):
    cost = np.asarray(cost, dtype=np.float64)
    transposed = False
    if cost.shape[0] > cost.shape[1]:
        cost = cost.T
        transposed = True
    n, m = cost.shape
    INF = 1e18
    u = np.zeros(n + 1)
    v = np.zeros(m + 1)
    p = np.zeros(m + 1, dtype=np.int64)
    way = np.zeros(m + 1, dtype=np.int64)
    for i in range(1, n + 1):
        p[0] = i
        j0 = 0
        minv = np.full(m + 1, INF)
        used = np.zeros(m + 1, dtype=bool)
        while True:
            used[j0] = True
            i0 = p[j0]
            delta = INF
            j1 = -1
            for j in range(1, m + 1):
                if not used[j]:
                    cur = cost[i0 - 1, j - 1] - u[i0] - v[j]
                    if cur < minv[j]:
                        minv[j] = cur
                        way[j] = j0
                    if minv[j] < delta:
                        delta = minv[j]
                        j1 = j
            for j in range(m + 1):
                if used[j]:
                    u[p[j]] += delta
                    v[j] -= delta
                else:
                    minv[j] -= delta
            j0 = j1
            if p[j0] == 0:
                break
        while True:
            j1 = way[j0]
            p[j0] = p[j1]
            j0 = j1
            if j0 == 0:
                break
    rows, cols = [], []
    for j in range(1, m + 1):
        if p[j] != 0:
            rows.append(p[j] - 1)
            cols.append(j - 1)
    rows = np.asarray(rows, dtype=np.int64)
    cols = np.asarray(cols, dtype=np.int64)
    if transposed:
        rows, cols = cols, rows
    order = np.argsort(rows)
    return rows[order], cols[order]


def _lsa(cost):
    if _scipy_lsa is not None:
        r, c = _scipy_lsa(np.asarray(cost, dtype=np.float64))
        return np.asarray(r, dtype=np.int64), np.asarray(c, dtype=np.int64)
    return linear_sum_assignment_np(cost)


# ---------------------------------------------------------------------------
# HungarianMatcher equivalent
# ---------------------------------------------------------------------------
class HungarianMatcher:
    def __init__(self, cost_class: float = 1.0, cost_span: float = 1.0):
        assert cost_class != 0 or cost_span != 0, "all costs can't be 0"
        self.cost_class = cost_class
        self.cost_span = cost_span

    def __call__(self, outputs, targets):
        # TODO(synk): forward_discontinuous branch (num_queries mismatch) not
        #             implemented; only the contiguous-span path is ported.
        pred_logits = outputs["pred_logits"]                 # [bs, nq, E]
        pred_left, pred_right = outputs["pred_boundaries"]   # each [bs, nq, S]
        tgt_ids = targets["labels"]                          # [T]
        tgt_spans = targets["spans"]                         # [T, 2]
        sizes = targets["sizes"]                             # python list, sum == T

        C = pallas_cost_matrix(pred_logits, pred_left, pred_right,
                               tgt_ids, tgt_spans,
                               self.cost_class, self.cost_span)
        C = np.asarray(jax.block_until_ready(C))              # [bs, nq, T]

        indices = []
        col_start = 0
        for b, sz in enumerate(sizes):
            c_b = C[b, :, col_start:col_start + sz]
            i, j = _lsa(c_b)
            indices.append((i.astype(np.int64), j.astype(np.int64)))
            col_start += sz
        return indices


# ---------------------------------------------------------------------------
# Pure-JAX reference for the cost matrix (sanity check)
# ---------------------------------------------------------------------------
def _ref_cost_matrix(pred_logits, pred_left, pred_right, tgt_ids, tgt_spans,
                     w_class, w_span):
    bs, nq, E = pred_logits.shape
    out_prob = jax.nn.softmax(pred_logits.reshape(bs * nq, E), axis=-1)
    left = pred_left.reshape(bs * nq, -1)
    right = pred_right.reshape(bs * nq, -1)
    cost_class = -out_prob[:, tgt_ids]
    cost_span = -(left[:, tgt_spans[:, 0]] + right[:, tgt_spans[:, 1]])
    return (w_span * cost_span + w_class * cost_class).reshape(bs, nq, -1)


if __name__ == "__main__":
    key = jax.random.PRNGKey(0)
    bs, num_queries, entity_types, seq_len = 2, 8, 6, 16
    sizes = [3, 5]
    T = sum(sizes)

    k1, k2, k3, k4, k5 = jax.random.split(key, 5)
    pred_logits = jax.random.normal(k1, (bs, num_queries, entity_types), jnp.float32)
    pred_left = jax.random.normal(k2, (bs, num_queries, seq_len), jnp.float32)
    pred_right = jax.random.normal(k3, (bs, num_queries, seq_len), jnp.float32)
    tgt_ids = jax.random.randint(k4, (T,), 0, entity_types, dtype=jnp.int32)
    tgt_spans = jax.random.randint(k5, (T, 2), 0, seq_len, dtype=jnp.int32)

    outputs = {"pred_logits": pred_logits,
               "pred_boundaries": (pred_left, pred_right)}
    targets = {"labels": tgt_ids, "spans": tgt_spans, "sizes": sizes}

    matcher = HungarianMatcher(cost_class=1.0, cost_span=1.0)

    # Check the in-kernel cost matrix against a pure-JAX reference.
    # Tolerance relaxed vs f32-exact because the kernel uses the EUP approx
    # reciprocal (~2^-12 relative) in the softmax denominator.
    C_kernel = pallas_cost_matrix(pred_logits, pred_left, pred_right,
                                  tgt_ids, tgt_spans, 1.0, 1.0)
    C_kernel = jax.block_until_ready(C_kernel)
    C_ref = _ref_cost_matrix(pred_logits, pred_left, pred_right,
                             tgt_ids, tgt_spans, 1.0, 1.0)
    np.testing.assert_allclose(np.asarray(C_kernel), np.asarray(C_ref),
                               rtol=5e-3, atol=5e-3)

    # Full forward: cost matrix (Pallas) + Hungarian assignment (host).
    indices = matcher(outputs, targets)
    assert len(indices) == bs
    for (i, j), sz in zip(indices, sizes):
        assert len(i) == len(j) == min(num_queries, sz)

    print("KERNEL_OK")
</pallas_src>

<mosaic_0001>
module attributes {stable_mosaic.version = 11 : i64} {
  func.func @_cost_kernel(%arg0: i32, %arg1: i32, %arg2: memref<8x38xf32, #tpu.memory_space<vmem>>, %arg3: memref<38x128xf32, #tpu.memory_space<vmem>>, %arg4: memref<8x128xf32, #tpu.memory_space<vmem>>) attributes {dimension_semantics = [#tpu.dimension_semantics<parallel>, #tpu.dimension_semantics<parallel>], iteration_bounds = array<i64: 2, 1>, scalar_prefetch = 0 : i64, scratch_operands = 0 : i64, tpu.core_type = #tpu.core_type<tc>, window_params = [{transform_indices = @transform_0, window_bounds = array<i64: 8, 38>}, {transform_indices = @transform_1, window_bounds = array<i64: 38, 128>}, {transform_indices = @transform_2, window_bounds = array<i64: 8, 128>}]} {
    %c0 = arith.constant 0 : index
    %c0_0 = arith.constant 0 : index
    %0 = vector.load %arg2[%c0, %c0_0] : memref<8x38xf32, #tpu.memory_space<vmem>>, vector<8x38xf32>
    %1 = tpu.iota {dimensions = array<i32: 1>} : vector<8x38xi32>
    %c6_i32 = arith.constant 6 : i32
    %2 = vector.broadcast %c6_i32 : i32 to vector<8x38xi32>
    %3 = arith.cmpi slt, %1, %2 : vector<8x38xi32>
    %cst = arith.constant 0xFF800000 : f32
    %4 = vector.broadcast %cst : f32 to vector<8x38xf32>
    %5 = arith.select %3, %0, %4 : vector<8x38xi1>, vector<8x38xf32>
    %cst_1 = arith.constant dense<0xFF800000> : vector<8xf32>
    %6 = vector.multi_reduction <maximumf>, %5, %cst_1 [1] : vector<8x38xf32> to vector<8xf32>
    %7 = vector.shape_cast %6 : vector<8xf32> to vector<8x1xf32>
    %8 = vector.broadcast %7 : vector<8x1xf32> to vector<8x38xf32>
    %9 = arith.subf %5, %8 : vector<8x38xf32>
    %10 = math.exp %9 : vector<8x38xf32>
    %cst_2 = arith.constant dense<0.000000e+00> : vector<8xf32>
    %11 = vector.multi_reduction <add>, %10, %cst_2 [1] : vector<8x38xf32> to vector<8xf32>
    %12 = vector.shape_cast %11 : vector<8xf32> to vector<8x1xf32>
    %13 = tpu.reciprocal %12 {approx = true} : vector<8x1xf32> -> vector<8x1xf32>
    %14 = vector.broadcast %13 : vector<8x1xf32> to vector<8x38xf32>
    %15 = arith.mulf %10, %14 : vector<8x38xf32>
    %16 = arith.select %3, %15, %0 : vector<8x38xi1>, vector<8x38xf32>
    %c0_3 = arith.constant 0 : index
    %c0_4 = arith.constant 0 : index
    %17 = vector.load %arg3[%c0_3, %c0_4] : memref<38x128xf32, #tpu.memory_space<vmem>>, vector<38x128xf32>
    %cst_5 = arith.constant dense<0.000000e+00> : vector<8x128xf32>
    %18 = tpu.matmul %16, %17, %cst_5 {dimension_numbers = #tpu.dot_dimension_numbers<[1], [0], [0], [1], [0, 0, 1, 1], [], []>} : vector<8x38xf32>, vector<38x128xf32>, vector<8x128xf32> -> vector<8x128xf32>
    %c0_6 = arith.constant 0 : index
    %c0_7 = arith.constant 0 : index
    %19 = vector.load %arg4[%c0_6, %c0_7] : memref<8x128xf32, #tpu.memory_space<vmem>>, vector<8x128xf32>
    tpu.vector_store %arg4[%c0_6, %c0_7], %18 {strides = array<i32>} : memref<8x128xf32, #tpu.memory_space<vmem>>, vector<8x128xf32>,
    return
  }
  func.func @transform_0(%arg0: i32, %arg1: i32) -> (i32, i32) {
    %c0_i32 = arith.constant 0 : i32
    %c0_i32_0 = arith.constant 0 : i32
    return %arg0, %c0_i32 : i32, i32
  }
  func.func @transform_1(%arg0: i32, %arg1: i32) -> (i32, i32) {
    %c0_i32 = arith.constant 0 : i32
    %c0_i32_0 = arith.constant 0 : i32
    return %c0_i32, %arg1 : i32, i32
  }
  func.func @transform_2(%arg0: i32, %arg1: i32) -> (i32, i32) {
    %c0_i32 = arith.constant 0 : i32
    return %arg0, %arg1 : i32, i32
  }
}

</mosaic_0001>

<bundles_post_ra>
// kernel: tpu_custom_call.1
= control target key start
LH: loop header
LB: loop body
LE: loop exit
PB: predicated region body
PF: predicated region fallthrough
CT: control target
= control target key end

     0   :  { %7 = vsyncpa [#allocation3], 0  ;;  %s869_s0 = inlined_call_operand.hbm [shape: f32[16,38], index: 0, kind: input, shape index: {}]   ;;  %s870_s1 = inlined_call_operand.hbm [shape: f32[38,128], index: 1, kind: input, shape index: {}]   ;;  %s871_s2 = inlined_call_operand.hbm [shape: f32[16,128], index: 2, kind: output, shape index: {}]  }
   0x1   :  { %9 = vsyncpa [#allocation3 + $0x1], 0 }
   0x2   :  { %10 = vsyncpa [#allocation6], 0 }
   0x3   :  { %11 = vsyncpa [#allocation4], 0 }
   0x4   :  { %13 = vsyncpa [#allocation4 + $0x1], 0  ;;  %s681_s9 = smov 0   ;;  %s683_s10 = smov 0  }
   0x5   :  { %s685_s11 = smov 0   ;;  %s687_s12 = smov 0  }
   0x6   :  { %s689_s13 = smov 0   ;;  %s691_s14 = smov 0  }
   0x7 LB: > { %s402_s15 = sadd.s32 4294967295, %s657_s14   ;;  %s403_s16 = sadd.s32 4294967294, %s657_s14   ;;  %s657_s14 = sphi %s691_s14, %s19_s14   ;;  %s653_s13 = sphi %s689_s13, %s889_s13   ;;  %s649_s12 = sphi %s687_s12, %s888_s12   ;;  %s645_s11 = sphi %s685_s11, %s887_s11   ;;  %s641_s10 = sphi %s683_s10, %s886_s10   ;;  %s637_s9 = sphi %s681_s9, %s885_s9  }
   0x8   : > { %p51_p0 = scmp.ne.s32.totalorder %s641_s10, %s637_s9  ;;  %p715_p1 = scmp.eq.s32.totalorder %s402_s15, 0 }
   0x9   : > { %p719_p2 = scmp.eq.s32.totalorder %s402_s15, 1  ;;  %p109_p3 = scmp.eq.s32.totalorder %s403_s16, 1 }
   0xa   : > { %p725_p4 = por %p715_p1, %p51_p0  ;;  %p404_p5 = scmp.ge.s32.totalorder %s657_s14, 1 }
   0xb   : > { %p730_p6 = por %p109_p3, %p51_p0  ;;  %p116_p7 = scmp.lt.s32.totalorder %s657_s14, 3 }
   0xc   : > { %s875_s19 = scalar_select %p725_p4, 1, 0 }
   0xd   : > { %s876_s20 = scalar_select %p730_p6, 1, 0 }
   0xe   : > { %p735_p8 = pnand %p404_p5, %p116_p7  ;;  %s659_s22 = smov [#allocation5]  }
   0xf   : > { %s130_s23 = sshll.u32 %s659_s22, 4  ;;  %s31_s25 = sadd.s32 1, %s653_s13  ;;  %s131_s23 = int_to_ptr.vmem [resolvable:$true] %s130_s23 }
  0x10   : > { %p446_p9 = pneg %p735_p8  ;;  %s530_s26 = scalar_lea.vmem %s131_s23, 640 }
  0x11   : > { %p531_p13 = scmp.ne.s32.totalorder %s131_s23, %s530_s26  ;;  %p538_p5 = scmp.lt.s32.totalorder %s131_s23, %s131_s23 }
  0x12   : > { %p744_p11 = pnand %p446_p9, %p715_p1  ;;  %p539_p7 = scmp.lt.s32.totalorder %s530_s26, %s530_s26 }
  0x14   : > { %p521_p12 = pneg %p744_p11  ;;  %p540_p6 = por %p539_p7, %p538_p5 }
  0x16   : > { %p533_p0 = pnand %p531_p13, %p521_p12 }
  0x18   : > { %p534_p3 = pneg %p533_p0 }
  0x1a   : > { %p541_p4 = pnand %p540_p6, %p534_p3 }
  0x1c   : > { %544 = shalt.err (!%p541_p4)
}
  0x1d   : > { %s660_s27 = smov 128   ;;  %s661_s28 = smov 8  }
  0x1e   : > { %449 = dma.hbm_to_vmem [thread:$0]  (!%p744_p11), %s870_s1, 640, %s131_s23, [#allocation6], %s660_s27, %s660_s27, %s661_s28  }
  0x1f   : > { %p33_p6 = scmp.ge.s32.totalorder %s31_s25, 2  ;;  %s38_s3 = sadd.s32 1, %s645_s11 }
  0x20   : > { %p45_p4 = scmp.ne.s32.totalorder %s645_s11, %s641_s10  ;;  %p46_p9 = scmp.eq.s32.totalorder %s657_s14, 0 }
  0x21   : > { %s891_s25 = smov (%p33_p6, %s31_s25), 0  ;;  %p459_p0 = scmp.lt.s32.totalorder %s657_s14, 2 }
  0x22   : > { %p762_p12 = por %p46_p9, %p45_p4  ;;  %p768_p13 = por %p719_p2, %p45_p4 }
  0x23   : > { %s35_s6 = ssub.s32 %s653_s13, %s891_s25  ;;  %s144_s7 = sand.u32 1, %s645_s11  }
  0x24   : > { %p36_p11 = scmp.eq.s32.totalorder %s35_s6, 0  ;;  %s407_s8 = sshll.u32 %s144_s7, 3 }
  0x25   : > { %s408_s16 = sshll.u32 %s653_s13, 7  ;;  %s148_s26 = scalar_lea.vmem [#allocation2], %s407_s8 }
  0x26   : > { %s777_s15 = scalar_select %p36_p11, %s645_s11, %s38_s3  }
  0x27   : > { %s153_s24 = scalar_lea.hbm %s869_s0, %s408_s16  ;;  %s155_s27 = sshll.u32 %s148_s26, 4  ;;  %s156_s27 = int_to_ptr.vmem [resolvable:$true] %s155_s27 }
  0x28   : > { %p785_p2 = pnand %p459_p0, %p762_p12  ;;  %s145_s28 = scalar_lea.sflag [#allocation3], %s144_s7 }
  0x29   : > { %s558_s29 = scalar_lea.vmem %s156_s27, 128  ;;  %s662_s30 = smov [#allocation2]  }
  0x2a   : > { %p547_p3 = pneg %p785_p2  ;;  %p559_p5 = scmp.ne.s32.totalorder %s156_s27, %s558_s29 }
  0x2b   : > { %s563_s3 = sshll.u32 %s662_s30, 4  ;;  %s564_s3 = int_to_ptr.vmem [resolvable:$false] %s563_s3 }
  0x2c   : > { %p561_p7 = pnand %p559_p5, %p547_p3  ;;  %s565_s6 = scalar_lea.vmem %s564_s3, 256 }
  0x2d   : > { %p566_p4 = scmp.lt.s32.totalorder %s156_s27, %s564_s3  ;;  %p567_p9 = scmp.lt.s32.totalorder %s565_s6, %s558_s29 }
  0x2e   : > { %p562_p6 = pneg %p561_p7 }
  0x2f   : > { %p568_p11 = por %p567_p9, %p566_p4 }
  0x31   : > { %p569_p10 = pnand %p568_p11, %p562_p6 }
  0x33   : > { %572 = shalt.err (!%p569_p10)
}
  0x34   : > { %453 = dma.hbm_to_vmem [thread:$0]  (!%p785_p2), %s153_s24, 128, %s156_s27, %s145_s28  }
  0x35   : > { %164 = sbr.rel (%p735_p8) target bundleno = 587 (0x24b), region = 28  ;;  %s796_s4 = sand.u32 (!%p735_p8), 1, %s641_s10  }
  0x36   : > { %s410_s7 = sshll.u32 (!%p735_p8), %s796_s4, 3  ;;  %s167_s8 = scalar_lea.sflag (!%p735_p8), [#allocation3], %s796_s4 }
  0x37   : > { %s170_s16 = scalar_lea.vmem (!%p735_p8), [#allocation2], %s410_s7  ;;  %p882_p12 = scmp.ne.s32.totalorder (!%p735_p8), %s875_s19, 0 }
  0x3a   : > { %624 = dma.done.wait (%p882_p12), %s167_s8, 128  }
  0x3b   : > { %626 = vsyncadd (%p882_p12), %s167_s8, 4294967168 }
  0x3c   : > { %628 = dma.done.wait (%p715_p1), [#allocation6], 640  }
  0x3d   : > { %630 = vsyncadd (%p715_p1), [#allocation6], 4294966656  ;;  %v196_v0 = vlaneseq  ;;  %vm200_vm1 = vcmask 310272   ;;  %v195_v2 = vld [vmem:[%s170_s16] sm:$0xff]  ;;  %v217_v10 = vld [vmem:[#allocation5 + $0x20] sm:$0x3f] }
  0x3e   : > { %vm221_vm2 = vcmask 1045504   ;;  %v663_v11 = vmov 0.0   ;;  %v216_v12 = vld [vmem:[#allocation5 + $0x18] sm:$0xff]  ;;  %vm664_vm3 = vmmov 0   ;;  %v215_v13 = vld [vmem:[#allocation5 + $0x10] sm:$0xff]  ;;  %v214_v14 = vld [vmem:[#allocation5 + $0x8] sm:$0xff] }
  0x3f   : > { %v197_v1 = vand.u32 127, %v196_v0  ;;  %425 = vmatprep.subr.mxu0 %v663_v11  ;;  %435 = vmatprep.mubr.msk.f32.mxu0 %vm664_vm3, %v663_v11  ;;  %v213_v15 = vld [vmem:[#allocation5] sm:$0xff]  ;;  %s194_s17 = scalar_lea.vmem [#allocation7], %s410_s7  ;;  %s416_s21 = sshll.u32 %s649_s12, 7 }
  0x40   : > { %426 = vmatpush3.msk.msra.mxu0 %vm221_vm2, %v217_v10  ;;  %s311_s19 = sshll.u32 %s194_s17, 4  ;;  %s823_s24 = scalar_lea.hbm %s871_s2, %s416_s21  ;;  %s818_s19 = int_to_ptr.vmem [resolvable:$true] %s311_s19 }
  0x41   : > { %vm198_vm0 = vcmp.lt.s32.totalorder %v197_v1, 6  ;;  %427 = vmatprep.subr.mxu0 %v663_v11  ;;  %s297_s26 = scalar_lea.sflag [#allocation4], %s796_s4  ;;  %s573_s27 = scalar_lea.vmem %s818_s19, 128 }
  0x42   : > { %v199_v3 = vsel %vm198_vm0, %v195_v2, -inf  ;;  %428 = vmatpush3.msra.mxu0 %v216_v12  ;;  %p574_p1 = scmp.ne.s32.totalorder %s818_s19, %s573_s27  ;;  %s665_s12 = smov [#allocation7]  }
  0x43   : > { %v201_v4 = vsel %vm200_vm1, %v199_v3, -inf  ;;  %429 = vmatprep.subr.mxu0 %v663_v11  ;;  %s577_s18 = sshll.u32 %s665_s12, 4  ;;  %s578_s18 = int_to_ptr.vmem [resolvable:$false] %s577_s18 }
  0x44   : > { %202 = vmax.xlane.f32.xlu0 %v201_v4  ;;  %430 = vmatpush3.msra.mxu0 %v215_v13  ;;  %p575_p8 = pnand %p574_p1, %p768_p13  ;;  %s579_s28 = scalar_lea.vmem %s578_s18, 256 }
  0x45   : > { %431 = vmatprep.subr.mxu0 %v663_v11  ;;  %p580_p0 = scmp.lt.s32.totalorder %s818_s19, %s578_s18  ;;  %p581_p2 = scmp.lt.s32.totalorder %s579_s28, %s573_s27 }
  0x46   : > { %432 = vmatpush3.msra.mxu0 %v214_v14  ;;  %p576_p10 = pneg %p575_p8 }
  0x47   : > { %433 = vmatprep.subr.mxu0 %v663_v11  ;;  %p582_p3 = por %p581_p2, %p580_p0 }
  0x48   : > { %434 = vmatpush3.msra.mxu0 %v213_v15 }
  0x49   : > { %p583_p5 = pnand %p582_p3, %p576_p10 }
  0xcd   : > { %v203_v5 = vpop.xlane.xlu0 %202 }
  0xce   : > { %v204_v6 = vsub.f32 %v199_v3, %v203_v5 }
  0xd0   : > { %v205_v7 = vmul.f32 1.442695, %v204_v6 }
  0xd2   : > { %515 = vpow2.f32 %v205_v7 }
  0xdf   : > { %v516_v8 = vpop.eup %515 }
  0xe0   : > { %v207_v9 = vsel %vm200_vm1, %v516_v8, 0.0 }
  0xe1   : > { %208 = vadd.xlane.f32.xlu0 %v207_v9 }
 0x16a   : > { %v209_v16 = vpop.xlane.xlu0 %208 }
 0x16b   : > { %517 = vrcp.f32 %v209_v16 }
 0x178   : > { %v518_v17 = vpop.eup %517 }
 0x179   : > { %v211_v18 = vmul.f32 %v518_v17, %v516_v8 }
 0x17b   : > { %v212_v19 = vsel %vm198_vm0, %v211_v18, %v195_v2 }
 0x17c   : > { %436 = vmatmul.mubr.msk.f32.vlgmr.msra.gmra.mxu0 %vm200_vm1, %v212_v19 }
 0x23c   : > { %v291_v20 = vpop.f32.mrf.mxu0 }
 0x23d   : > { %295 = vst [vmem:[%s194_s17] sm:$0xff] %v291_v20 }
 0x23e   : > { %v437_v21 = vpop.f32.mrf.mxu0 }
 0x23f   : > { %586 = shalt.err (!%p583_p5)
}
 0x240   : > { %s587_s29 = scalar_lea.hbm %s823_s24, 128  ;;  %s591_s6 = scalar_lea.hbm %s871_s2, 256 }
 0x241   : > { %p588_p7 = scmp.ne.s32.totalorder %s823_s24, %s587_s29  ;;  %p592_p9 = scmp.lt.s32.totalorder %s823_s24, %s871_s2 }
 0x242   : > { %p593_p11 = scmp.lt.s32.totalorder %s591_s6, %s587_s29 }
 0x243   : > { %p589_p6 = pnand %p588_p7, %p768_p13 }
 0x244   : > { %p594_p12 = por %p593_p11, %p592_p9 }
 0x245   : > { %p590_p4 = pneg %p589_p6 }
 0x247   : > { %p595_p1 = pnand %p594_p12, %p590_p4 }
 0x249   : > { %598 = shalt.err (!%p595_p1)
}
 0x24a   : > { %444 = dma.vmem_to_hbm [thread:$0]  (%p768_p13), %s818_s19, 128, %s823_s24, %s297_s26  }
 0x24b PF: > { %s323_s8 = sand.u32 1, %s637_s9   ;;  %p883_p8 = scmp.ne.s32.totalorder %s876_s20, 0 }
 0x24c   : > { %p884_p10 = scmp.ge.s32.totalorder %s657_s14, 2  ;;  %s324_s16 = scalar_lea.sflag [#allocation4], %s323_s8 }
 0x24e   : > { %p455_p0 = pnand %p884_p10, %p883_p8 }
 0x250   : > { %p456_p2 = pneg %p455_p0 }
 0x252   : > { %632 = dma.done.wait (%p456_p2), %s324_s16, 128  }
 0x253   : > { %634 = vsyncadd (%p456_p2), %s324_s16, 4294967168  ;;  %s19_s14 = sadd.s32 1, %s657_s14   ;;  %s885_s9 = smov %s641_s10 }
 0x254   : > { %p16_p3 = scmp.ge.s32.totalorder %s19_s14, 4   ;;  %s886_s10 = smov %s645_s11 }
 0x255   : > { %s887_s11 = smov %s777_s15  ;;  %s888_s12 = smov %s653_s13 }
 0x256   : > { %s889_s13 = smov %s891_s25  ;;  %18 = sbr.rel (!%p16_p3) target bundleno = 7 (0x7), region = 78 }
 0x25b   :  { %329 = vsyncpa [#allocation3], 1 }
 0x25c   :  { %331 = vsyncpa [#allocation3 + $0x1], 1 }
 0x25d   :  { %332 = vsyncpa [#allocation6], 1 }
 0x25e   :  { %333 = vsyncpa [#allocation4], 1 }
 0x25f   :  { %335 = vsyncpa [#allocation4 + $0x1], 1 }

</bundles_post_ra>
